<compile_context>
chip_gen: v6e
topology: v6e:2x2x1
jax: 0.10.0
libtpu: 0.0.40
codegen_flags: <defaults>
</compile_context>

<pallas_src>
import functools

import jax
import jax.numpy as jnp
from jax import lax
from jax.experimental import pallas as pl
from jax.experimental.pallas import tpu as pltpu


def _triplet_sim_loss_kernel(up_ref, pp_ref, un_ref, pn_ref, o_ref,
                             *, alpha, eps, agg):
    f32 = jnp.float32

    def normalize(ref):
        # Row-wise L2 normalization in f32 regardless of input dtype; norm is
        # clamped at eps via the sum of squares (rsqrt -> EUP slot, ~free).
        x = ref[...].astype(f32)
        sq = jnp.sum(x * x, axis=1, keepdims=True)            # (R, 1)
        inv = lax.rsqrt(jnp.maximum(sq, f32(eps) * f32(eps)))
        return x * inv

    up = normalize(up_ref)   # (Mp, D)
    pp = normalize(pp_ref)   # (Np, D)
    un = normalize(un_ref)   # (Mn, D)
    pn = normalize(pn_ref)   # (Nn, D)

    if agg == "mean":
        # mean_ij cos_ij == dot(mean_i a_hat_i, mean_j b_hat_j): no MxN matrix.
        m_up = jnp.mean(up, axis=0, keepdims=True)  # (1, D)
        m_pp = jnp.mean(pp, axis=0, keepdims=True)
        m_un = jnp.mean(un, axis=0, keepdims=True)
        m_pn = jnp.mean(pn, axis=0, keepdims=True)
        l1 = jnp.sum(m_up * m_pp)
        l2 = jnp.sum(m_un * m_pp)
        l3 = jnp.sum(m_up * m_pn)
    elif agg in ("max_p", "max_s"):
        bf16 = jnp.bfloat16
        mp = up.shape[0]

        # Contract feature (last) axes directly; avoids an explicit transpose
        # of the (N, D) operand (same contraction as flash-attn 'bqd,bkd->bqk').
        contract = (((1,), (1,)), ((), ()))

        def agg_fn(cos):
            if agg == "max_p":
                return jnp.mean(jnp.max(cos, axis=0))
            return jnp.mean(jnp.max(cos, axis=1))

        # Fuse l1/l2: stack the two LHS blocks (f32 concat is sublane-aligned,
        # then a single cast to bf16) so pp's MXU weight push is shared.
        lhs12 = jnp.concatenate([up, un], axis=0).astype(bf16)  # (Mp+Mn, D)
        pp_b = pp.astype(bf16)
        cos12 = lax.dot_general(lhs12, pp_b, dimension_numbers=contract,
                                preferred_element_type=f32)     # (Mp+Mn, Np)
        l1 = agg_fn(cos12[:mp, :])
        l2 = agg_fn(cos12[mp:, :])

        cos3 = lax.dot_general(up.astype(bf16), pn.astype(bf16),
                               dimension_numbers=contract,
                               preferred_element_type=f32)      # (Mp, Nn)
        l3 = agg_fn(cos3)
    else:
        raise ValueError(f"unsupported agg: {agg}")

    a = f32(alpha)
    zero = f32(0.0)
    loss = jnp.maximum(zero, a - l1 + l2) + jnp.maximum(zero, a - l1 + l3)
    # Lane-dense (1, 128) output slab (unmasked full-lane store); sliced in the
    # wrapper.
    o_ref[...] = jnp.full((1, 128), loss, dtype=f32)


def triplet_sim_loss(utt_pos, per_pos, utt_neg, per_neg,
                     *, alpha=0.5, eps=1e-6, agg="mean"):
    """JAX/Pallas equivalent of TripletSimLoss.forward ('mean'/'max_p'/'max_s')."""
    D = utt_pos.shape[1]
    assert per_pos.shape[1] == D and utt_neg.shape[1] == D and per_neg.shape[1] == D

    # No wrapper-side padding and no dtype upcast: raw arrays go straight into
    # VMEM as full-array blocks; the kernel does all math in f32.
    kernel = functools.partial(_triplet_sim_loss_kernel,
                               alpha=alpha, eps=eps, agg=agg)

    vmem = functools.partial(pl.BlockSpec, memory_space=pltpu.MemorySpace.VMEM)

    # Size scoped VMEM to the real footprint: inputs + f32 normalized copies
    # (+ bf16 copies and cos tiles for the max_* paths), with 2x headroom.
    mp, mn = utt_pos.shape[0], utt_neg.shape[0]
    npp, nnn = per_pos.shape[0], per_neg.shape[0]
    rows = mp + mn + npp + nnn
    in_bytes = sum(int(x.size) * x.dtype.itemsize
                   for x in (utt_pos, per_pos, utt_neg, per_neg))
    est = in_bytes + rows * D * 4                       # f32 normalized copies
    if agg != "mean":
        est += (rows + mp + mn) * D * 2                 # bf16 copies (incl. stack)
        est += ((mp + mn) * npp + mp * nnn) * 4         # cos tiles, f32
    vmem_limit = int(min(64 << 20, max(8 << 20, 2 * est + (1 << 20))))

    out = pl.pallas_call(
        kernel,
        out_shape=jax.ShapeDtypeStruct((1, 128), jnp.float32),
        in_specs=[vmem(), vmem(), vmem(), vmem()],
        out_specs=vmem(),
        compiler_params=pltpu.CompilerParams(vmem_limit_bytes=vmem_limit),
    )(utt_pos, per_pos, utt_neg, per_neg)
    return out[0, 0]


# TODO(synk): type='opt' (ot.emd) and type='ap' (scipy linear_sum_assignment)
# are host-side combinatorial solvers with no clean Pallas equivalent; only
# 'mean' / 'max_p' / 'max_s' aggregations are implemented in-kernel.


if __name__ == "__main__":
    key = jax.random.PRNGKey(0)
    k1, k2, k3, k4 = jax.random.split(key, 4)

    # small shapes: 8 utterance / persona embeddings, hidden dim 32
    utt_pos = jax.random.normal(k1, (8, 32), dtype=jnp.float32)
    per_pos = jax.random.normal(k2, (8, 32), dtype=jnp.float32)
    utt_neg = jax.random.normal(k3, (8, 32), dtype=jnp.float32)
    per_neg = jax.random.normal(k4, (8, 32), dtype=jnp.float32)

    # pure-JAX reference (exact torch math: divide by clamp of norm product)
    def ref_pc(m1, m2, eps=1e-6):
        w1 = jnp.linalg.norm(m1, axis=1, keepdims=True)
        w2 = jnp.linalg.norm(m2, axis=1, keepdims=True)
        return (m1 @ m2.T) / jnp.maximum(w1 * w2.T, eps)

    def ref_loss(agg, alpha=0.5):
        def agg_fn(sim):
            if agg == "mean":
                return jnp.mean(sim)
            if agg == "max_p":
                return jnp.mean(jnp.max(sim, axis=0))
            return jnp.mean(jnp.max(sim, axis=1))
        l1 = agg_fn(ref_pc(utt_pos, per_pos))
        l2 = agg_fn(ref_pc(utt_neg, per_pos))
        l3 = agg_fn(ref_pc(utt_pos, per_neg))
        return (jnp.maximum(0.0, alpha - l1 + l2)
                + jnp.maximum(0.0, alpha - l1 + l3))

    # max_p/max_s feed bf16 operands to the MXU -> ~1e-3-level cosine error,
    # so those aggregations get a looser tolerance than the exact 'mean' path.
    tol = {"mean": 1e-5, "max_p": 2e-2, "max_s": 2e-2}

    ok = True
    for agg in ("mean", "max_p", "max_s"):
        loss = triplet_sim_loss(utt_pos, per_pos, utt_neg, per_neg,
                                alpha=0.5, eps=1e-6, agg=agg)
        jax.block_until_ready(loss)
        ref = ref_loss(agg)
        if not jnp.allclose(loss, ref, atol=tol[agg], rtol=tol[agg]):
            ok = False
            print(f"MISMATCH agg={agg}: kernel={loss} ref={ref}")

    assert ok
    print("KERNEL_OK")
</pallas_src>

<mosaic_0001>
module attributes {stable_mosaic.version = 11 : i64} {
  func.func @_triplet_sim_loss_kernel(%arg0: memref<8x32xf32, #tpu.memory_space<vmem>>, %arg1: memref<8x32xf32, #tpu.memory_space<vmem>>, %arg2: memref<8x32xf32, #tpu.memory_space<vmem>>, %arg3: memref<8x32xf32, #tpu.memory_space<vmem>>, %arg4: memref<1x128xf32, #tpu.memory_space<vmem>>) attributes {dimension_semantics = [], scalar_prefetch = 0 : i64, scratch_operands = 0 : i64, tpu.core_type = #tpu.core_type<tc>} {
    %c0 = arith.constant 0 : index
    %c0_0 = arith.constant 0 : index
    %0 = vector.load %arg0[%c0, %c0_0] : memref<8x32xf32, #tpu.memory_space<vmem>>, vector<8x32xf32>
    %1 = arith.mulf %0, %0 : vector<8x32xf32>
    %cst = arith.constant dense<0.000000e+00> : vector<8xf32>
    %2 = vector.multi_reduction <add>, %1, %cst [1] : vector<8x32xf32> to vector<8xf32>
    %3 = vector.shape_cast %2 : vector<8xf32> to vector<8x1xf32>
    %cst_1 = arith.constant 9.99999997E-7 : f32
    %cst_2 = arith.constant 9.99999997E-7 : f32
    %4 = arith.mulf %cst_1, %cst_2 : f32
    %5 = vector.broadcast %4 : f32 to vector<8x1xf32>
    %6 = arith.maximumf %3, %5 : vector<8x1xf32>
    %7 = math.rsqrt %6 : vector<8x1xf32>
    %8 = vector.broadcast %7 : vector<8x1xf32> to vector<8x32xf32>
    %9 = arith.mulf %0, %8 : vector<8x32xf32>
    %c0_3 = arith.constant 0 : index
    %c0_4 = arith.constant 0 : index
    %10 = vector.load %arg1[%c0_3, %c0_4] : memref<8x32xf32, #tpu.memory_space<vmem>>, vector<8x32xf32>
    %11 = arith.mulf %10, %10 : vector<8x32xf32>
    %cst_5 = arith.constant dense<0.000000e+00> : vector<8xf32>
    %12 = vector.multi_reduction <add>, %11, %cst_5 [1] : vector<8x32xf32> to vector<8xf32>
    %13 = vector.shape_cast %12 : vector<8xf32> to vector<8x1xf32>
    %cst_6 = arith.constant 9.99999997E-7 : f32
    %cst_7 = arith.constant 9.99999997E-7 : f32
    %14 = arith.mulf %cst_6, %cst_7 : f32
    %15 = vector.broadcast %14 : f32 to vector<8x1xf32>
    %16 = arith.maximumf %13, %15 : vector<8x1xf32>
    %17 = math.rsqrt %16 : vector<8x1xf32>
    %18 = vector.broadcast %17 : vector<8x1xf32> to vector<8x32xf32>
    %19 = arith.mulf %10, %18 : vector<8x32xf32>
    %c0_8 = arith.constant 0 : index
    %c0_9 = arith.constant 0 : index
    %20 = vector.load %arg2[%c0_8, %c0_9] : memref<8x32xf32, #tpu.memory_space<vmem>>, vector<8x32xf32>
    %21 = arith.mulf %20, %20 : vector<8x32xf32>
    %cst_10 = arith.constant dense<0.000000e+00> : vector<8xf32>
    %22 = vector.multi_reduction <add>, %21, %cst_10 [1] : vector<8x32xf32> to vector<8xf32>
    %23 = vector.shape_cast %22 : vector<8xf32> to vector<8x1xf32>
    %cst_11 = arith.constant 9.99999997E-7 : f32
    %cst_12 = arith.constant 9.99999997E-7 : f32
    %24 = arith.mulf %cst_11, %cst_12 : f32
    %25 = vector.broadcast %24 : f32 to vector<8x1xf32>
    %26 = arith.maximumf %23, %25 : vector<8x1xf32>
    %27 = math.rsqrt %26 : vector<8x1xf32>
    %28 = vector.broadcast %27 : vector<8x1xf32> to vector<8x32xf32>
    %29 = arith.mulf %20, %28 : vector<8x32xf32>
    %c0_13 = arith.constant 0 : index
    %c0_14 = arith.constant 0 : index
    %30 = vector.load %arg3[%c0_13, %c0_14] : memref<8x32xf32, #tpu.memory_space<vmem>>, vector<8x32xf32>
    %31 = arith.mulf %30, %30 : vector<8x32xf32>
    %cst_15 = arith.constant dense<0.000000e+00> : vector<8xf32>
    %32 = vector.multi_reduction <add>, %31, %cst_15 [1] : vector<8x32xf32> to vector<8xf32>
    %33 = vector.shape_cast %32 : vector<8xf32> to vector<8x1xf32>
    %cst_16 = arith.constant 9.99999997E-7 : f32
    %cst_17 = arith.constant 9.99999997E-7 : f32
    %34 = arith.mulf %cst_16, %cst_17 : f32
    %35 = vector.broadcast %34 : f32 to vector<8x1xf32>
    %36 = arith.maximumf %33, %35 : vector<8x1xf32>
    %37 = math.rsqrt %36 : vector<8x1xf32>
    %38 = vector.broadcast %37 : vector<8x1xf32> to vector<8x32xf32>
    %39 = arith.mulf %30, %38 : vector<8x32xf32>
    %cst_18 = arith.constant dense<0.000000e+00> : vector<32xf32>
    %40 = vector.multi_reduction <add>, %9, %cst_18 [0] : vector<8x32xf32> to vector<32xf32>
    %41 = vector.shape_cast %40 : vector<32xf32> to vector<1x32xf32>
    %cst_19 = arith.constant 8.000000e+00 : f32
    %42 = vector.broadcast %cst_19 : f32 to vector<1x32xf32>
    %43 = arith.divf %41, %42 : vector<1x32xf32>
    %cst_20 = arith.constant dense<0.000000e+00> : vector<32xf32>
    %44 = vector.multi_reduction <add>, %19, %cst_20 [0] : vector<8x32xf32> to vector<32xf32>
    %45 = vector.shape_cast %44 : vector<32xf32> to vector<1x32xf32>
    %cst_21 = arith.constant 8.000000e+00 : f32
    %46 = vector.broadcast %cst_21 : f32 to vector<1x32xf32>
    %47 = arith.divf %45, %46 : vector<1x32xf32>
    %cst_22 = arith.constant dense<0.000000e+00> : vector<32xf32>
    %48 = vector.multi_reduction <add>, %29, %cst_22 [0] : vector<8x32xf32> to vector<32xf32>
    %49 = vector.shape_cast %48 : vector<32xf32> to vector<1x32xf32>
    %cst_23 = arith.constant 8.000000e+00 : f32
    %50 = vector.broadcast %cst_23 : f32 to vector<1x32xf32>
    %51 = arith.divf %49, %50 : vector<1x32xf32>
    %cst_24 = arith.constant dense<0.000000e+00> : vector<32xf32>
    %52 = vector.multi_reduction <add>, %39, %cst_24 [0] : vector<8x32xf32> to vector<32xf32>
    %53 = vector.shape_cast %52 : vector<32xf32> to vector<1x32xf32>
    %cst_25 = arith.constant 8.000000e+00 : f32
    %54 = vector.broadcast %cst_25 : f32 to vector<1x32xf32>
    %55 = arith.divf %53, %54 : vector<1x32xf32>
    %56 = arith.mulf %43, %47 : vector<1x32xf32>
    %57 = vector.shape_cast %56 : vector<1x32xf32> to vector<1x1x32xf32>
    %cst_26 = arith.constant dense<0.000000e+00> : vector<1xf32>
    %58 = vector.multi_reduction <add>, %57, %cst_26 [1, 2] : vector<1x1x32xf32> to vector<1xf32>
    %59 = vector.shape_cast %58 : vector<1xf32> to vector<1x1x1xf32>
    %60 = vector.extract %59[0, 0, 0] : f32 from vector<1x1x1xf32>
    %61 = arith.mulf %51, %47 : vector<1x32xf32>
    %62 = vector.shape_cast %61 : vector<1x32xf32> to vector<1x1x32xf32>
    %cst_27 = arith.constant dense<0.000000e+00> : vector<1xf32>
    %63 = vector.multi_reduction <add>, %62, %cst_27 [1, 2] : vector<1x1x32xf32> to vector<1xf32>
    %64 = vector.shape_cast %63 : vector<1xf32> to vector<1x1x1xf32>
    %65 = vector.extract %64[0, 0, 0] : f32 from vector<1x1x1xf32>
    %66 = arith.mulf %43, %55 : vector<1x32xf32>
    %67 = vector.shape_cast %66 : vector<1x32xf32> to vector<1x1x32xf32>
    %cst_28 = arith.constant dense<0.000000e+00> : vector<1xf32>
    %68 = vector.multi_reduction <add>, %67, %cst_28 [1, 2] : vector<1x1x32xf32> to vector<1xf32>
    %69 = vector.shape_cast %68 : vector<1xf32> to vector<1x1x1xf32>
    %70 = vector.extract %69[0, 0, 0] : f32 from vector<1x1x1xf32>
    %cst_29 = arith.constant 5.000000e-01 : f32
    %71 = arith.subf %cst_29, %60 : f32
    %72 = arith.addf %71, %65 : f32
    %cst_30 = arith.constant 0.000000e+00 : f32
    %73 = arith.maximumf %cst_30, %72 : f32
    %cst_31 = arith.constant 5.000000e-01 : f32
    %74 = arith.subf %cst_31, %60 : f32
    %75 = arith.addf %74, %70 : f32
    %cst_32 = arith.constant 0.000000e+00 : f32
    %76 = arith.maximumf %cst_32, %75 : f32
    %77 = arith.addf %73, %76 : f32
    %78 = vector.broadcast %77 : f32 to vector<1x128xf32>
    %c0_33 = arith.constant 0 : index
    %c0_34 = arith.constant 0 : index
    %79 = vector.load %arg4[%c0_33, %c0_34] : memref<1x128xf32, #tpu.memory_space<vmem>>, vector<1x128xf32>
    tpu.vector_store %arg4[%c0_33, %c0_34], %78 {strides = array<i32>} : memref<1x128xf32, #tpu.memory_space<vmem>>, vector<1x128xf32>,
    return
  }
}

</mosaic_0001>

<bundles_post_ra>
// kernel: tpu_custom_call.1
= control target key start
LH: loop header
LB: loop body
LE: loop exit
PB: predicated region body
PF: predicated region fallthrough
CT: control target
= control target key end

     0   :  { %9 = vsyncpa [#allocation3], 0  ;;  %s372_s0 = inlined_call_operand.hbm [shape: f32[8,32], index: 0, kind: input, shape index: {}]   ;;  %s373_s1 = inlined_call_operand.hbm [shape: f32[8,32], index: 1, kind: input, shape index: {}]   ;;  %s374_s2 = inlined_call_operand.hbm [shape: f32[8,32], index: 2, kind: input, shape index: {}]   ;;  %s375_s3 = inlined_call_operand.hbm [shape: f32[8,32], index: 3, kind: input, shape index: {}]   ;;  %s376_s4 = inlined_call_operand.hbm [shape: f32[1,128], index: 4, kind: output, shape index: {}]  }
   0x1   :  { %10 = vsyncpa [#allocation6], 0 }
   0x2   :  { %11 = vsyncpa [#allocation9], 0 }
   0x3   :  { %12 = vsyncpa [#allocation4], 0  ;;  %s318_s15 = smov [#allocation5]   ;;  %s319_s17 = smov [#allocation2]  }
   0x4   :  { %s29_s16 = sshll.u32 %s318_s15, 4  ;;  %s19_s18 = sshll.u32 %s319_s17, 4  ;;  %s30_s16 = int_to_ptr.vmem [resolvable:$true] %s29_s16  ;;  %s20_s18 = int_to_ptr.vmem [resolvable:$true] %s19_s18 }
   0x5   :  { %s218_s19 = scalar_lea.vmem %s30_s16, 128  ;;  %p223_p1 = scmp.lt.s32.totalorder %s30_s16, %s30_s16 }
   0x6   :  { %p219_p0 = scmp.ne.s32.totalorder %s30_s16, %s218_s19  ;;  %p224_p2 = scmp.lt.s32.totalorder %s218_s19, %s218_s19 }
   0x8   :  { %p225_p3 = por %p224_p2, %p223_p1 }
   0xa   :  { %p226_p4 = pnand %p225_p3, %p219_p0 }
   0xc   :  { %229 = shalt.err (!%p226_p4)
}
   0xd   :  { %32 = dma.hbm_to_vmem [thread:$0]  %s373_s1, 128, %s30_s16, [#allocation6]  }
   0xe   :  { %s238_s22 = scalar_lea.vmem %s20_s18, 128  ;;  %p243_p6 = scmp.lt.s32.totalorder %s20_s18, %s20_s18 }
   0xf   :  { %p239_p5 = scmp.ne.s32.totalorder %s20_s18, %s238_s22  ;;  %p244_p7 = scmp.lt.s32.totalorder %s238_s22, %s238_s22 }
  0x11   :  { %p245_p8 = por %p244_p7, %p243_p6 }
  0x13   :  { %p246_p9 = pnand %p245_p8, %p239_p5 }
  0x15   :  { %249 = shalt.err (!%p246_p9)
}
  0x16   :  { %22 = dma.hbm_to_vmem [thread:$0]  %s372_s0, 128, %s20_s18, [#allocation3]  }
  0x17   :  { %s320_s25 = smov [#allocation7]   ;;  %s321_s27 = smov [#allocation8]  }
  0x18   :  { %s39_s26 = sshll.u32 %s320_s25, 4  ;;  %s49_s28 = sshll.u32 %s321_s27, 4  ;;  %s40_s26 = int_to_ptr.vmem [resolvable:$true] %s39_s26  ;;  %s50_s28 = int_to_ptr.vmem [resolvable:$true] %s49_s28 }
  0x19   :  { %s258_s29 = scalar_lea.vmem %s40_s26, 128  ;;  %p263_p11 = scmp.lt.s32.totalorder %s40_s26, %s40_s26 }
  0x1a   :  { %p259_p10 = scmp.ne.s32.totalorder %s40_s26, %s258_s29  ;;  %p264_p12 = scmp.lt.s32.totalorder %s258_s29, %s258_s29 }
  0x1c   :  { %p265_p13 = por %p264_p12, %p263_p11 }
  0x1e   :  { %p266_p0 = pnand %p265_p13, %p259_p10 }
  0x20   :  { %269 = shalt.err (!%p266_p0)
}
  0x21   :  { %42 = dma.hbm_to_vmem [thread:$0]  %s374_s2, 128, %s40_s26, [#allocation6]  }
  0x22   :  { %s278_s5 = scalar_lea.vmem %s50_s28, 128  ;;  %p283_p2 = scmp.lt.s32.totalorder %s50_s28, %s50_s28 }
  0x23   :  { %p279_p1 = scmp.ne.s32.totalorder %s50_s28, %s278_s5  ;;  %p284_p3 = scmp.lt.s32.totalorder %s278_s5, %s278_s5 }
  0x25   :  { %p285_p4 = por %p284_p3, %p283_p2 }
  0x27   :  { %p286_p5 = pnand %p285_p4, %p279_p1 }
  0x29   :  { %289 = shalt.err (!%p286_p5)
}
  0x2a   :  { %52 = dma.hbm_to_vmem [thread:$0]  %s375_s3, 128, %s50_s28, [#allocation9]  }
  0x2b   :  { %310 = dma.done.wait [#allocation3], 128  }
  0x2c   :  { %311 = vsyncadd [#allocation3], 4294967168 }
  0x2d   :  { %312 = dma.done.wait [#allocation6], 256  }
  0x2e   :  { %313 = vsyncadd [#allocation6], 4294967040 }
  0x2f   :  { %314 = dma.done.wait [#allocation9], 128  }
  0x30   :  { %315 = vsyncadd [#allocation9], 4294967168  ;;  %vm67_vm0 = vcmask 261120   ;;  %v82_v0 = vld [vmem:[#allocation7] sm:$0xff]  ;;  %v65_v1 = vld [vmem:[#allocation2] sm:$0xff]  ;;  %vm132_vm1 = vcmask 253952  }
  0x31   :  { %v90_v2 = vld [vmem:[#allocation8] sm:$0xff]  ;;  %v83_v3 = vmul.f32 %v82_v0, %v82_v0  ;;  %v66_v4 = vmul.f32 %v65_v1, %v65_v1  ;;  %v74_v6 = vld [vmem:[#allocation5] sm:$0xff]  ;;  %s322_s11 = smov [#allocation10]   ;;  %s323_s13 = smov 0.0  }
  0x32   :  { %v91_v5 = vmul.f32 %v90_v2, %v90_v2  ;;  %v75_v7 = vmul.f32 %v74_v6, %v74_v6  ;;  %s179_s12 = sshll.u32 %s322_s11, 4  ;;  %s180_s12 = int_to_ptr.vmem [resolvable:$true] %s179_s12 }
  0x33   :  { %v84_v8 = vsel %vm67_vm0, %v83_v3, 0.0  ;;  %v68_v9 = vsel %vm67_vm0, %v66_v4, 0.0  ;;  %s290_s17 = scalar_lea.vmem %s180_s12, 16  ;;  %s294_s18 = scalar_lea.vmem %s180_s12, 32 }
  0x34   :  { %85 = vadd.xlane.f32.xlu1 %v84_v8  ;;  %69 = vadd.xlane.f32.xlu0 %v68_v9  ;;  %v92_v10 = vsel %vm67_vm0, %v91_v5, 0.0  ;;  %v76_v11 = vsel %vm67_vm0, %v75_v7, 0.0  ;;  %p291_p6 = scmp.ne.s32.totalorder %s180_s12, %s290_s17  ;;  %p295_p7 = scmp.lt.s32.totalorder %s180_s12, %s180_s12 }
  0x35   :  { %p296_p8 = scmp.lt.s32.totalorder %s294_s18, %s290_s17 }
  0x37   :  { %p297_p9 = por %p296_p8, %p295_p7 }
  0x38   :  { %93 = vadd.xlane.f32.xlu1 %v92_v10  ;;  %77 = vadd.xlane.f32.xlu0 %v76_v11 }
  0x39   :  { %p298_p10 = pnand %p297_p9, %p291_p6 }
  0xbd   :  { %v86_v12 = vpop.xlane.xlu1 %85  ;;  %v70_v13 = vpop.xlane.xlu0 %69 }
  0xbe   :  { %v87_v14 = vmax.f32 %v86_v12, 1e-12  ;;  %v71_v15 = vmax.f32 %v70_v13, 1e-12 }
  0xc0   :  { %202 = vrsqrt.f32 %v87_v14 }
  0xc1   :  { %204 = vrsqrt.f32 %v71_v15  ;;  %v94_v16 = vpop.xlane.xlu1 %93  ;;  %v78_v17 = vpop.xlane.xlu0 %77 }
  0xc2   :  { %v95_v18 = vmax.f32 %v94_v16, 1e-12  ;;  %v79_v19 = vmax.f32 %v78_v17, 1e-12 }
  0xc4   :  { %206 = vrsqrt.f32 %v95_v18 }
  0xc5   :  { %208 = vrsqrt.f32 %v79_v19 }
  0xcd   :  { %v203_v20 = vpop.eup %202 }
  0xce   :  { %v205_v21 = vpop.eup %204  ;;  %v89_v22 = vmul.f32 %v203_v20, %v82_v0 }
  0xcf   :  { %v73_v23 = vmul.f32 %v205_v21, %v65_v1 }
  0xd0   :  { %v115_v24 = vsel %vm67_vm0, %v89_v22, 0.0 }
  0xd1   :  { %v207_v25 = vpop.eup %206  ;;  %v116_v26 = vrot.slane %v115_v24, 4  ;;  %v98_v27 = vsel %vm67_vm0, %v73_v23, 0.0 }
  0xd2   :  { %v209_v28 = vpop.eup %208  ;;  %v99_v29 = vrot.slane %v98_v27, 4  ;;  %v97_v30 = vmul.f32 %v207_v25, %v90_v2 }
  0xd3   :  { %v81_v31 = vmul.f32 %v209_v28, %v74_v6  ;;  %v117_v32 = vadd.f32 %v116_v26, %v115_v24 }
  0xd4   :  { %v100_v33 = vadd.f32 %v99_v29, %v98_v27  ;;  %v123_v34 = vsel %vm67_vm0, %v97_v30, 0.0 }
  0xd5   :  { %v107_v35 = vsel %vm67_vm0, %v81_v31, 0.0  ;;  %v118_v36 = vrot.slane %v117_v32, 2  ;;  %v124_v37 = vrot.slane %v123_v34, 4 }
  0xd6   :  { %v108_v38 = vrot.slane %v107_v35, 4  ;;  %v101_v39 = vrot.slane %v100_v33, 2 }
  0xd7   :  { %v119_v40 = vadd.f32 %v118_v36, %v117_v32  ;;  %v125_v41 = vadd.f32 %v124_v37, %v123_v34 }
  0xd8   :  { %v109_v42 = vadd.f32 %v108_v38, %v107_v35  ;;  %v102_v43 = vadd.f32 %v101_v39, %v100_v33 }
  0xd9   :  { %v126_v44 = vrot.slane %v125_v41, 2  ;;  %v120_v46 = vrot.slane %v119_v40, 1 }
  0xda   :  { %v110_v45 = vrot.slane %v109_v42, 2  ;;  %v103_v47 = vrot.slane %v102_v43, 1 }
  0xdb   :  { %v127_v48 = vadd.f32 %v126_v44, %v125_v41  ;;  %v121_v52 = vadd.f32 %v120_v46, %v119_v40 }
  0xdc   :  { %v111_v49 = vadd.f32 %v110_v45, %v109_v42  ;;  %v104_v53 = vadd.f32 %v103_v47, %v102_v43 }
  0xdd   :  { %v128_v50 = vrot.slane %v127_v48, 1  ;;  %v122_v57 = vmul.f32 0.125, %v121_v52 }
  0xde   :  { %v112_v51 = vrot.slane %v111_v49, 1  ;;  %v106_v58 = vmul.f32 0.125, %v104_v53 }
  0xdf   :  { %v129_v54 = vadd.f32 %v128_v50, %v127_v48 }
  0xe0   :  { %v113_v55 = vadd.f32 %v112_v51, %v111_v49 }
  0xe1   :  { %v130_v59 = vmul.f32 0.125, %v129_v54 }
  0xe2   :  { %v114_v56 = vmul.f32 0.125, %v113_v55 }
  0xe3   :  { %v154_v0 = vmul.f32 %v130_v59, %v106_v58 }
  0xe4   :  { %v143_v60 = vmul.f32 %v122_v57, %v114_v56  ;;  %v131_v61 = vmul.f32 %v114_v56, %v106_v58 }
  0xe5   :  { %v155_v1 = vsel %vm132_vm1, %v154_v0, 0.0 }
  0xe6   :  { %v144_v62 = vsel %vm132_vm1, %v143_v60, 0.0  ;;  %v133_v63 = vsel %vm132_vm1, %v131_v61, 0.0 }
  0xe7   :  { %145 = vadd.xlane.f32.xlu1 %v144_v62  ;;  %134 = vadd.xlane.f32.xlu0 %v133_v63 }
  0xeb   :  { %156 = vadd.xlane.f32.xlu0 %v155_v1 }
 0x170   :  { %v146_v2 = vpop.xlane.xlu1 %145  ;;  %v135_v3 = vpop.xlane.xlu0 %134 }
 0x171   :  { %v147_v4 = vrot.slane %v146_v2, 4  ;;  %v136_v5 = vrot.slane %v135_v3, 4 }
 0x173   :  { %v148_v6 = vadd.f32 %v147_v4, %v146_v2  ;;  %v137_v7 = vadd.f32 %v136_v5, %v135_v3 }
 0x174   :  { %v157_v8 = vpop.xlane.xlu0 %156 }
 0x175   :  { %v149_v9 = vrot.slane %v148_v6, 2  ;;  %v138_v10 = vrot.slane %v137_v7, 2  ;;  %v158_v11 = vrot.slane %v157_v8, 4 }
 0x177   :  { %v150_v12 = vadd.f32 %v149_v9, %v148_v6  ;;  %v159_v13 = vadd.f32 %v158_v11, %v157_v8  ;;  %v139_v14 = vadd.f32 %v138_v10, %v137_v7 }
 0x179   :  { %v160_v15 = vrot.slane %v159_v13, 2  ;;  %v140_v16 = vrot.slane %v139_v14, 1  ;;  %v151_v17 = vrot.slane %v150_v12, 1 }
 0x17b   :  { %v161_v18 = vadd.f32 %v160_v15, %v159_v13  ;;  %v141_v19 = vadd.f32 %v140_v16, %v139_v14  ;;  %v152_v20 = vadd.f32 %v151_v17, %v150_v12 }
 0x17d   :  { %190 = vpush %v141_v19  ;;  %v162_v21 = vrot.slane %v161_v18, 1 }
 0x17e   :  { %192 = vpush %v152_v20 }
 0x17f   :  { %v163_v22 = vadd.f32 %v162_v21, %v161_v18 }
 0x181   :  { %194 = vpush %v163_v22 }
 0x1ae   :  { %s191_s2 = spop %190 }
 0x1af   :  { %s165_s3 = ssub.f32 0.5, %s191_s2  ;;  %s193_s7 = spop %192 }
 0x1b1   :  { %s166_s8 = sadd.f32 %s193_s7, %s165_s3 }
 0x1b2   :  { %s195_s9 = spop %194 }
 0x1b3   :  { %s168_s10 = sadd.f32 %s195_s9, %s165_s3  ;;  %s167_s14 = smax.f32 %s323_s13, %s166_s8 }
 0x1b5   :  { %s169_s15 = smax.f32 %s323_s13, %s168_s10 }
 0x1b6   :  { %s170_s16 = sadd.f32 %s169_s15, %s167_s14 }
 0x1b8   :  { %v171_v23 = vstv %s170_s16 }
 0x1b9   :  { %172 = vst [vmem:[#allocation10] sm:$0x1] %v171_v23 }
 0x1ba   :  { %301 = shalt.err (!%p298_p10)
}
 0x1bb   :  { %182 = dma.vmem_to_hbm [thread:$0]  %s180_s12, 16, %s376_s4, [#allocation4]  }
 0x1bc   :  { %316 = dma.done.wait [#allocation4], 16  }
 0x1bd   :  { %317 = vsyncadd [#allocation4], 4294967280 }
 0x1be   :  { %186 = vsyncpa [#allocation3], 1 }
 0x1bf   :  { %187 = vsyncpa [#allocation6], 1 }
 0x1c0   :  { %188 = vsyncpa [#allocation9], 1 }
 0x1c1   :  { %189 = vsyncpa [#allocation4], 1 }

</bundles_post_ra>
